<compile_context>
chip_gen: v7x
topology: tpu7x:2x2x1
jax: 0.10.0
libtpu: 0.0.40
codegen_flags: <defaults>
</compile_context>

<pallas_src>
import math
import functools

import jax
import jax.numpy as jnp
from jax.experimental import pallas as pl
from jax.experimental.pallas import tpu as pltpu


_LOG_2PI = math.log(2.0 * math.pi)
_ROW_TILE_CAP = 4096      # original-batch rows per grid step (review: 2048-4096)
_PACK_CAP = 8             # cap on the row-packing factor


def _round_up(x, m):
    return ((x + m - 1) // m) * m


def _cdiv(a, b):
    return -(-a // b)


def _detect_core_parallel():
    # Only v7x has 2 TensorCores per chip; CORE_PARALLEL is the only semantics
    # that actually changes codegen for cross-core sharding.
    try:
        kind = jax.devices()[0].device_kind.lower()
    except Exception:
        return False
    return "v7" in kind


_USE_CORE_PARALLEL = _detect_core_parallel()
_BATCH_DIM_SEMANTICS = (pltpu.CORE_PARALLEL,) if _USE_CORE_PARALLEL else ("parallel",)


# ----------------------------------------------------------------------------
# Kernels
# ----------------------------------------------------------------------------
def _mlp_mean(state, w1, b1, w2, b2, w3, b3):
    """MLP hot path on packed rows: Linear->tanh->Linear->tanh->Linear.

    Weights are block-diagonal replicated (kron(I_P, W)), so each packed row
    holds P independent batch rows.  f32 MXU accumulation throughout; state may
    arrive as bf16 (optional low-precision input path) and is cast up first.
    """
    x = state.astype(jnp.float32)
    h1 = jnp.tanh(jnp.dot(x, w1, preferred_element_type=jnp.float32) + b1)
    h2 = jnp.tanh(jnp.dot(h1, w2, preferred_element_type=jnp.float32) + b2)
    return jnp.dot(h2, w3, preferred_element_type=jnp.float32) + b3


def actor_mean_logp_kernel(
    state_ref, w1_ref, b1_ref, w2_ref, b2_ref, w3_ref, b3_ref,
    inv_std_ref, neg_half_sel_ref, logp_const_ref, action_ref,
    mean_ref, logp_ref,
):
    mean = _mlp_mean(
        state_ref[...],
        w1_ref[...], b1_ref[...],
        w2_ref[...], b2_ref[...],
        w3_ref[...], b3_ref[...],
    )
    mean_ref[...] = mean                                   # single store per output

    # Normal(mean, std).log_prob(action).sum(-1), packed layout:
    #   z      = (a - m) * inv_std                         (TBp, P*A)
    #   logp_k = sum_{j: j//A==k} -0.5*z_j^2 + const       via selector matmul
    z = (action_ref[...].astype(jnp.float32) - mean) * inv_std_ref[...]
    logp_ref[...] = (
        jnp.dot(z * z, neg_half_sel_ref[...], preferred_element_type=jnp.float32)
        + logp_const_ref[...]
    )


def actor_mean_kernel(
    state_ref, w1_ref, b1_ref, w2_ref, b2_ref, w3_ref, b3_ref,
    mean_ref,
):
    mean_ref[...] = _mlp_mean(
        state_ref[...],
        w1_ref[...], b1_ref[...],
        w2_ref[...], b2_ref[...],
        w3_ref[...], b3_ref[...],
    )


# ----------------------------------------------------------------------------
# Wrapper (parameter setup / packing glue in plain JAX)
# ----------------------------------------------------------------------------
def init_actor_params(key, state_dim, action_dim, hidden_sizes):
    """Deterministic synthetic parameters matching the shapes of Actor.__init__."""
    sizes = (state_dim,) + tuple(hidden_sizes) + (action_dim,)
    params = {}
    for i, (fan_in, fan_out) in enumerate(zip(sizes[:-1], sizes[1:])):
        key, wk, bk = jax.random.split(key, 3)
        bound = 1.0 / math.sqrt(fan_in)
        params[f"w{i+1}"] = jax.random.uniform(
            wk, (fan_in, fan_out), jnp.float32, -bound, bound)
        params[f"b{i+1}"] = jax.random.uniform(
            bk, (1, fan_out), jnp.float32, -bound, bound)
    # self.std = nn.Parameter(torch.ones(action_dim))
    params["std"] = jnp.ones((action_dim,), jnp.float32)
    return params


@functools.partial(jax.jit, static_argnames=("low_precision_inputs",))
def actor_forward(params, state, action=None, *, low_precision_inputs=False):
    """Returns ((mean, std), log_prob) mirroring Actor.forward -> (pi, log_prob)."""
    B, S = state.shape
    std = params["std"]
    A = std.shape[-1]
    w1, b1 = params["w1"], params["b1"]
    w2, b2 = params["w2"], params["b2"]
    w3, b3 = params["w3"], params["b3"]
    H1, H2 = w1.shape[1], w2.shape[1]

    # --- lane-packing factor: pack P rows per vreg so compute is ~128-lane dense.
    P = max(1, min(_PACK_CAP, 128 // max(S, H1, H2, A)))

    # Minimal padding: only to a multiple of P (needed by the packed reshape).
    # The packed-row axis is NOT padded to the tile; Pallas masks the boundary block.
    B_pad = _round_up(B, P)
    if B_pad != B:
        state = jnp.pad(state, ((0, B_pad - B), (0, 0)))
        if action is not None:
            action = jnp.pad(action, ((0, B_pad - B), (0, 0)))
    B_pack = B_pad // P

    in_dtype = jnp.bfloat16 if low_precision_inputs else jnp.float32
    state_p = state.astype(in_dtype).reshape(B_pack, P * S)   # free, contiguous

    # Block-diagonal replicated weights / tiled biases (tiny, VMEM-resident).
    eye_p = jnp.eye(P, dtype=jnp.float32)
    w1p, b1p = jnp.kron(eye_p, w1), jnp.tile(b1, (1, P))
    w2p, b2p = jnp.kron(eye_p, w2), jnp.tile(b2, (1, P))
    w3p, b3p = jnp.kron(eye_p, w3), jnp.tile(b3, (1, P))

    # --- adaptive batch tiling over packed rows (boundary garbage < 8 packed rows).
    tile_cap = _round_up(max(8, _ROW_TILE_CAP // P), 8)
    n_tiles = _cdiv(B_pack, tile_cap)
    if _USE_CORE_PARALLEL and B_pack >= 16:
        n_tiles = max(n_tiles, 2)          # guarantee both v7x TCs get work
    TBp = _round_up(_cdiv(B_pack, n_tiles), 8)
    grid = (_cdiv(B_pack, TBp),)

    def batch_spec(width):                 # tiled over the packed-batch axis
        return pl.BlockSpec((TBp, width), lambda i: (i, 0))

    def const_spec(shape):                 # VMEM-resident across grid steps
        return pl.BlockSpec(shape, lambda i: (0, 0))

    weight_specs = [
        const_spec((P * S, P * H1)), const_spec((1, P * H1)),
        const_spec((P * H1, P * H2)), const_spec((1, P * H2)),
        const_spec((P * H2, P * A)), const_spec((1, P * A)),
    ]

    # 32 MiB scoped VMEM holds the lane-padded double buffers with large
    # headroom on every generation (v7x included: 64 MiB physical / 32 scoped).
    compiler_params = pltpu.CompilerParams(
        dimension_semantics=_BATCH_DIM_SEMANTICS,
        vmem_limit_bytes=32 * 1024 * 1024,
    )

    if action is not None:
        inv_std_p = jnp.tile((1.0 / std).reshape(1, A), (1, P))
        # Selector that row-sums each packed sub-row's A lanes (with the -0.5 folded in).
        neg_half_sel = -0.5 * (
            (jnp.arange(P * A)[:, None] // A) == jnp.arange(P)[None, :]
        ).astype(jnp.float32)
        # Gaussian normalisation term collapsed to a single per-row scalar.
        logp_const = (-(jnp.sum(jnp.log(std)) + 0.5 * A * _LOG_2PI)
                      ) * jnp.ones((1, P), jnp.float32)
        action_p = action.astype(in_dtype).reshape(B_pack, P * A)

        mean_p, logp_p = pl.pallas_call(
            actor_mean_logp_kernel,
            grid=grid,
            out_shape=(jax.ShapeDtypeStruct((B_pack, P * A), jnp.float32),
                       jax.ShapeDtypeStruct((B_pack, P), jnp.float32)),
            in_specs=[batch_spec(P * S)] + weight_specs
                     + [const_spec((1, P * A)), const_spec((P * A, P)),
                        const_spec((1, P)), batch_spec(P * A)],
            out_specs=(batch_spec(P * A), batch_spec(P)),
            compiler_params=compiler_params,
        )(state_p, w1p, b1p, w2p, b2p, w3p, b3p,
          inv_std_p, neg_half_sel, logp_const, action_p)

        mean = mean_p.reshape(B_pad, A)       # free, contiguous unpack
        log_prob = logp_p.reshape(B_pad)
        if B_pad != B:
            mean, log_prob = mean[:B], log_prob[:B]
    else:
        mean_p = pl.pallas_call(
            actor_mean_kernel,
            grid=grid,
            out_shape=jax.ShapeDtypeStruct((B_pack, P * A), jnp.float32),
            in_specs=[batch_spec(P * S)] + weight_specs,
            out_specs=batch_spec(P * A),
            compiler_params=compiler_params,
        )(state_p, w1p, b1p, w2p, b2p, w3p, b3p)
        mean = mean_p.reshape(B_pad, A)
        if B_pad != B:
            mean = mean[:B]
        log_prob = None

    # Normal(mean, std) parameters; std returned un-broadcast (consumer broadcasts lazily).
    # TODO(synk): Distribution object / sampling (get_action) have no Pallas
    # equivalent; callers receive the (mean, std) parameters instead.
    pi = (mean, std)
    return pi, log_prob


# Pure-JAX reference for correctness checks.
def actor_forward_ref(params, state, action):
    h1 = jnp.tanh(state @ params["w1"] + params["b1"])
    h2 = jnp.tanh(h1 @ params["w2"] + params["b2"])
    mean = h2 @ params["w3"] + params["b3"]
    std = params["std"]
    logp = (-0.5 * ((action - mean) / std) ** 2
            - jnp.log(std) - 0.5 * _LOG_2PI).sum(-1)
    return mean, logp


if __name__ == "__main__":
    STATE_DIM, ACTION_DIM = 16, 4
    HIDDEN_SIZES = (32, 32)

    key = jax.random.PRNGKey(0)
    kp, ks, ka, ks2, ka2 = jax.random.split(key, 5)
    params = init_actor_params(kp, STATE_DIM, ACTION_DIM, HIDDEN_SIZES)

    # --- small batch: single tile, exercises block > array masking -----------
    B = 8
    state = jax.random.normal(ks, (B, STATE_DIM), jnp.float32)
    action = jax.random.normal(ka, (B, ACTION_DIM), jnp.float32)

    (mean, std), log_prob = actor_forward(params, state, action)
    jax.block_until_ready((mean, std, log_prob))

    # forward(state) path (no action -> no log-prob), mirrors the PyTorch API.
    (mean2, _), lp2 = actor_forward(params, state)
    jax.block_until_ready(mean2)
    assert lp2 is None

    mean_ref, logp_ref = actor_forward_ref(params, state, action)
    assert jnp.allclose(mean, mean_ref, atol=1e-5, rtol=1e-5)
    assert jnp.allclose(log_prob, logp_ref, atol=2e-5, rtol=1e-4)
    assert jnp.allclose(mean2, mean_ref, atol=1e-5, rtol=1e-5)
    assert mean.shape == (B, ACTION_DIM) and log_prob.shape == (B,)
    assert std.shape == (ACTION_DIM,)

    # --- larger ragged batch: packed-row count not a multiple of the tile ----
    B2 = 600
    state2 = jax.random.normal(ks2, (B2, STATE_DIM), jnp.float32)
    action2 = jax.random.normal(ka2, (B2, ACTION_DIM), jnp.float32)
    (mean_b, _), logp_b = actor_forward(params, state2, action2)
    jax.block_until_ready((mean_b, logp_b))

    mean_b_ref, logp_b_ref = actor_forward_ref(params, state2, action2)
    assert mean_b.shape == (B2, ACTION_DIM) and logp_b.shape == (B2,)
    assert jnp.allclose(mean_b, mean_b_ref, atol=1e-5, rtol=1e-5)
    assert jnp.allclose(logp_b, logp_b_ref, atol=2e-5, rtol=1e-4)

    # --- batch not a multiple of the packing factor: minimal P-pad path ------
    B3 = 13
    state3 = jax.random.normal(ks2, (B3, STATE_DIM), jnp.float32)
    action3 = jax.random.normal(ka2, (B3, ACTION_DIM), jnp.float32)
    (mean_c, _), logp3 = actor_forward(params, state3, action3)
    jax.block_until_ready((mean_c, logp3))

    mean_c_ref, logp3_ref = actor_forward_ref(params, state3, action3)
    assert mean_c.shape == (B3, ACTION_DIM) and logp3.shape == (B3,)
    assert jnp.allclose(mean_c, mean_c_ref, atol=1e-5, rtol=1e-5)
    assert jnp.allclose(logp3, logp3_ref, atol=2e-5, rtol=1e-4)

    # --- optional bf16-input path (HBM-traffic halving on v6e/v7x) -----------
    (mean_lp, _), logp_lp = actor_forward(params, state2, action2,
                                          low_precision_inputs=True)
    jax.block_until_ready((mean_lp, logp_lp))
    assert bool(jnp.all(jnp.isfinite(mean_lp))) and bool(jnp.all(jnp.isfinite(logp_lp)))

    print("KERNEL_OK")
</pallas_src>

<mosaic_0001>
module attributes {stable_mosaic.version = 11 : i64} {
  func.func @actor_mean_logp_kernel(%arg0: i32, %arg1: memref<8x64xf32, #tpu.memory_space<vmem>>, %arg2: memref<64x128xf32, #tpu.memory_space<vmem>>, %arg3: memref<1x128xf32, #tpu.memory_space<vmem>>, %arg4: memref<128x128xf32, #tpu.memory_space<vmem>>, %arg5: memref<1x128xf32, #tpu.memory_space<vmem>>, %arg6: memref<128x16xf32, #tpu.memory_space<vmem>>, %arg7: memref<1x16xf32, #tpu.memory_space<vmem>>, %arg8: memref<1x16xf32, #tpu.memory_space<vmem>>, %arg9: memref<16x4xf32, #tpu.memory_space<vmem>>, %arg10: memref<1x4xf32, #tpu.memory_space<vmem>>, %arg11: memref<8x16xf32, #tpu.memory_space<vmem>>, %arg12: memref<8x16xf32, #tpu.memory_space<vmem>>, %arg13: memref<8x4xf32, #tpu.memory_space<vmem>>) attributes {dimension_semantics = [#tpu.dimension_semantics<parallel>], iteration_bounds = array<i64: 1>, scalar_prefetch = 0 : i64, scratch_operands = 0 : i64, tpu.core_type = #tpu.core_type<tc>, window_params = [{transform_indices = @transform_0, window_bounds = array<i64: 8, 64>}, {pipeline_mode = #tpu.pipeline_mode<synchronous>, transform_indices = @transform_1, window_bounds = array<i64: 64, 128>}, {pipeline_mode = #tpu.pipeline_mode<synchronous>, transform_indices = @transform_2, window_bounds = array<i64: 1, 128>}, {pipeline_mode = #tpu.pipeline_mode<synchronous>, transform_indices = @transform_3, window_bounds = array<i64: 128, 128>}, {pipeline_mode = #tpu.pipeline_mode<synchronous>, transform_indices = @transform_4, window_bounds = array<i64: 1, 128>}, {pipeline_mode = #tpu.pipeline_mode<synchronous>, transform_indices = @transform_5, window_bounds = array<i64: 128, 16>}, {pipeline_mode = #tpu.pipeline_mode<synchronous>, transform_indices = @transform_6, window_bounds = array<i64: 1, 16>}, {pipeline_mode = #tpu.pipeline_mode<synchronous>, transform_indices = @transform_7, window_bounds = array<i64: 1, 16>}, {pipeline_mode = #tpu.pipeline_mode<synchronous>, transform_indices = @transform_8, window_bounds = array<i64: 16, 4>}, {pipeline_mode = #tpu.pipeline_mode<synchronous>, transform_indices = @transform_9, window_bounds = array<i64: 1, 4>}, {transform_indices = @transform_10, window_bounds = array<i64: 8, 16>}, {transform_indices = @transform_11, window_bounds = array<i64: 8, 16>}, {transform_indices = @transform_12, window_bounds = array<i64: 8, 4>}]} {
    %c0 = arith.constant 0 : index
    %c0_0 = arith.constant 0 : index
    %0 = vector.load %arg1[%c0, %c0_0] : memref<8x64xf32, #tpu.memory_space<vmem>>, vector<8x64xf32>
    %c0_1 = arith.constant 0 : index
    %c0_2 = arith.constant 0 : index
    %1 = vector.load %arg2[%c0_1, %c0_2] : memref<64x128xf32, #tpu.memory_space<vmem>>, vector<64x128xf32>
    %c0_3 = arith.constant 0 : index
    %c0_4 = arith.constant 0 : index
    %2 = vector.load %arg3[%c0_3, %c0_4] : memref<1x128xf32, #tpu.memory_space<vmem>>, vector<1x128xf32>
    %c0_5 = arith.constant 0 : index
    %c0_6 = arith.constant 0 : index
    %3 = vector.load %arg4[%c0_5, %c0_6] : memref<128x128xf32, #tpu.memory_space<vmem>>, vector<128x128xf32>
    %c0_7 = arith.constant 0 : index
    %c0_8 = arith.constant 0 : index
    %4 = vector.load %arg5[%c0_7, %c0_8] : memref<1x128xf32, #tpu.memory_space<vmem>>, vector<1x128xf32>
    %c0_9 = arith.constant 0 : index
    %c0_10 = arith.constant 0 : index
    %5 = vector.load %arg6[%c0_9, %c0_10] : memref<128x16xf32, #tpu.memory_space<vmem>>, vector<128x16xf32>
    %c0_11 = arith.constant 0 : index
    %c0_12 = arith.constant 0 : index
    %6 = vector.load %arg7[%c0_11, %c0_12] : memref<1x16xf32, #tpu.memory_space<vmem>>, vector<1x16xf32>
    %cst = arith.constant dense<0.000000e+00> : vector<8x128xf32>
    %7 = tpu.matmul %0, %1, %cst {dimension_numbers = #tpu.dot_dimension_numbers<[1], [0], [0], [1], [0, 0, 1, 1], [], []>} : vector<8x64xf32>, vector<64x128xf32>, vector<8x128xf32> -> vector<8x128xf32>
    %8 = vector.broadcast %2 : vector<1x128xf32> to vector<8x128xf32>
    %9 = arith.addf %7, %8 : vector<8x128xf32>
    %10 = math.tanh %9 : vector<8x128xf32>
    %cst_13 = arith.constant dense<0.000000e+00> : vector<8x128xf32>
    %11 = tpu.matmul %10, %3, %cst_13 {dimension_numbers = #tpu.dot_dimension_numbers<[1], [0], [0], [1], [0, 0, 1, 1], [], []>} : vector<8x128xf32>, vector<128x128xf32>, vector<8x128xf32> -> vector<8x128xf32>
    %12 = vector.broadcast %4 : vector<1x128xf32> to vector<8x128xf32>
    %13 = arith.addf %11, %12 : vector<8x128xf32>
    %14 = math.tanh %13 : vector<8x128xf32>
    %cst_14 = arith.constant dense<0.000000e+00> : vector<8x16xf32>
    %15 = tpu.matmul %14, %5, %cst_14 {dimension_numbers = #tpu.dot_dimension_numbers<[1], [0], [0], [1], [0, 0, 1, 1], [], []>} : vector<8x128xf32>, vector<128x16xf32>, vector<8x16xf32> -> vector<8x16xf32>
    %16 = vector.broadcast %6 : vector<1x16xf32> to vector<8x16xf32>
    %17 = arith.addf %15, %16 : vector<8x16xf32>
    %c0_15 = arith.constant 0 : index
    %c0_16 = arith.constant 0 : index
    %18 = vector.load %arg12[%c0_15, %c0_16] : memref<8x16xf32, #tpu.memory_space<vmem>>, vector<8x16xf32>
    tpu.vector_store %arg12[%c0_15, %c0_16], %17 {strides = array<i32>} : memref<8x16xf32, #tpu.memory_space<vmem>>, vector<8x16xf32>,
    %c0_17 = arith.constant 0 : index
    %c0_18 = arith.constant 0 : index
    %19 = vector.load %arg11[%c0_17, %c0_18] : memref<8x16xf32, #tpu.memory_space<vmem>>, vector<8x16xf32>
    %20 = arith.subf %19, %17 : vector<8x16xf32>
    %c0_19 = arith.constant 0 : index
    %c0_20 = arith.constant 0 : index
    %21 = vector.load %arg8[%c0_19, %c0_20] : memref<1x16xf32, #tpu.memory_space<vmem>>, vector<1x16xf32>
    %22 = vector.broadcast %21 : vector<1x16xf32> to vector<8x16xf32>
    %23 = arith.mulf %20, %22 : vector<8x16xf32>
    %24 = arith.mulf %23, %23 : vector<8x16xf32>
    %c0_21 = arith.constant 0 : index
    %c0_22 = arith.constant 0 : index
    %25 = vector.load %arg9[%c0_21, %c0_22] : memref<16x4xf32, #tpu.memory_space<vmem>>, vector<16x4xf32>
    %cst_23 = arith.constant dense<0.000000e+00> : vector<8x4xf32>
    %26 = tpu.matmul %24, %25, %cst_23 {dimension_numbers = #tpu.dot_dimension_numbers<[1], [0], [0], [1], [0, 0, 1, 1], [], []>} : vector<8x16xf32>, vector<16x4xf32>, vector<8x4xf32> -> vector<8x4xf32>
    %c0_24 = arith.constant 0 : index
    %c0_25 = arith.constant 0 : index
    %27 = vector.load %arg10[%c0_24, %c0_25] : memref<1x4xf32, #tpu.memory_space<vmem>>, vector<1x4xf32>
    %28 = vector.broadcast %27 : vector<1x4xf32> to vector<8x4xf32>
    %29 = arith.addf %26, %28 : vector<8x4xf32>
    %c0_26 = arith.constant 0 : index
    %c0_27 = arith.constant 0 : index
    %30 = vector.load %arg13[%c0_26, %c0_27] : memref<8x4xf32, #tpu.memory_space<vmem>>, vector<8x4xf32>
    tpu.vector_store %arg13[%c0_26, %c0_27], %29 {strides = array<i32>} : memref<8x4xf32, #tpu.memory_space<vmem>>, vector<8x4xf32>,
    return
  }
  func.func @transform_0(%arg0: i32) -> (i32, i32) {
    %c0_i32 = arith.constant 0 : i32
    %c0_i32_0 = arith.constant 0 : i32
    return %arg0, %c0_i32 : i32, i32
  }
  func.func @transform_1(%arg0: i32) -> (i32, i32) {
    %c0_i32 = arith.constant 0 : i32
    %c0_i32_0 = arith.constant 0 : i32
    %c0_i32_1 = arith.constant 0 : i32
    return %c0_i32, %c0_i32_0 : i32, i32
  }
  func.func @transform_2(%arg0: i32) -> (i32, i32) {
    %c0_i32 = arith.constant 0 : i32
    %c0_i32_0 = arith.constant 0 : i32
    %c0_i32_1 = arith.constant 0 : i32
    return %c0_i32, %c0_i32_0 : i32, i32
  }
  func.func @transform_3(%arg0: i32) -> (i32, i32) {
    %c0_i32 = arith.constant 0 : i32
    %c0_i32_0 = arith.constant 0 : i32
    %c0_i32_1 = arith.constant 0 : i32
    return %c0_i32, %c0_i32_0 : i32, i32
  }
  func.func @transform_4(%arg0: i32) -> (i32, i32) {
    %c0_i32 = arith.constant 0 : i32
    %c0_i32_0 = arith.constant 0 : i32
    %c0_i32_1 = arith.constant 0 : i32
    return %c0_i32, %c0_i32_0 : i32, i32
  }
  func.func @transform_5(%arg0: i32) -> (i32, i32) {
    %c0_i32 = arith.constant 0 : i32
    %c0_i32_0 = arith.constant 0 : i32
    %c0_i32_1 = arith.constant 0 : i32
    return %c0_i32, %c0_i32_0 : i32, i32
  }
  func.func @transform_6(%arg0: i32) -> (i32, i32) {
    %c0_i32 = arith.constant 0 : i32
    %c0_i32_0 = arith.constant 0 : i32
    %c0_i32_1 = arith.constant 0 : i32
    return %c0_i32, %c0_i32_0 : i32, i32
  }
  func.func @transform_7(%arg0: i32) -> (i32, i32) {
    %c0_i32 = arith.constant 0 : i32
    %c0_i32_0 = arith.constant 0 : i32
    %c0_i32_1 = arith.constant 0 : i32
    return %c0_i32, %c0_i32_0 : i32, i32
  }
  func.func @transform_8(%arg0: i32) -> (i32, i32) {
    %c0_i32 = arith.constant 0 : i32
    %c0_i32_0 = arith.constant 0 : i32
    %c0_i32_1 = arith.constant 0 : i32
    return %c0_i32, %c0_i32_0 : i32, i32
  }
  func.func @transform_9(%arg0: i32) -> (i32, i32) {
    %c0_i32 = arith.constant 0 : i32
    %c0_i32_0 = arith.constant 0 : i32
    %c0_i32_1 = arith.constant 0 : i32
    return %c0_i32, %c0_i32_0 : i32, i32
  }
  func.func @transform_10(%arg0: i32) -> (i32, i32) {
    %c0_i32 = arith.constant 0 : i32
    %c0_i32_0 = arith.constant 0 : i32
    return %arg0, %c0_i32 : i32, i32
  }
  func.func @transform_11(%arg0: i32) -> (i32, i32) {
    %c0_i32 = arith.constant 0 : i32
    %c0_i32_0 = arith.constant 0 : i32
    return %arg0, %c0_i32 : i32, i32
  }
  func.func @transform_12(%arg0: i32) -> (i32, i32) {
    %c0_i32 = arith.constant 0 : i32
    %c0_i32_0 = arith.constant 0 : i32
    return %arg0, %c0_i32 : i32, i32
  }
}

</mosaic_0001>

<bundles_post_ra>
// kernel: mul.47
= control target key start
LH: loop header
LB: loop body
LE: loop exit
PB: predicated region body
PF: predicated region fallthrough
CT: control target
= control target key end

     0   :  { %s20_s0 = inlined_call_operand.<no memory space> [shape: f32[], index: 0, kind: input, shape index: {}]   ;;  %s21_s1 = inlined_call_operand.vmem [shape: f32[1,4], index: 1, kind: output, shape index: {}]  }
   0x1   :  { %v2_v0 = vstv %s20_s0 }
   0x2   :  { %3 = vst [vmem:[%s21_s1] sm:$0x1] %v2_v0 }

// kernel: actor_forward.1
= control target key start
LH: loop header
LB: loop body
LE: loop exit
PB: predicated region body
PF: predicated region fallthrough
CT: control target
= control target key end

     0   :  { %v712_v3 = vmov 0.0|0.0   ;;  %vm713_vm0 = vmmov 0   ;;  %v714_v6 = vmov 0.0   ;;  %vm90_vm1 = vcmask 523264   ;;  %s962_s0 = inlined_call_operand.vmem [shape: f32[2,64], index: 0, kind: input, shape index: {}]   ;;  %s963_s1 = inlined_call_operand.vmem [shape: f32[64,128], index: 1, kind: input, shape index: {}]   ;;  %s964_s2 = inlined_call_operand.vmem [shape: f32[1,128], index: 2, kind: input, shape index: {}]   ;;  %s965_s3 = inlined_call_operand.vmem [shape: f32[128,128], index: 3, kind: input, shape index: {}]   ;;  %s966_s4 = inlined_call_operand.vmem [shape: f32[1,128], index: 4, kind: input, shape index: {}]   ;;  %s967_s5 = inlined_call_operand.vmem [shape: f32[128,16], index: 5, kind: input, shape index: {}]   ;;  %s968_s6 = inlined_call_operand.vmem [shape: f32[1,16], index: 6, kind: input, shape index: {}]   ;;  %s969_s7 = inlined_call_operand.vmem [shape: f32[1,16], index: 7, kind: input, shape index: {}]   ;;  %s970_s8 = inlined_call_operand.vmem [shape: f32[16,4], index: 8, kind: input, shape index: {}]   ;;  %s971_s9 = inlined_call_operand.vmem [shape: f32[1,4], index: 9, kind: input, shape index: {}]   ;;  %s972_s10 = inlined_call_operand.vmem [shape: f32[2,16], index: 10, kind: input, shape index: {}]   ;;  %s973_s11 = inlined_call_operand.vmem [shape: f32[2,16], index: 11, kind: output, shape index: {0}]   ;;  %s974_s12 = inlined_call_operand.vmem [shape: f32[2,4], index: 12, kind: output, shape index: {1}]  }
   0x1   :  { %v41_v0 = vld [vmem:[%s963_s1] sm:$0xff]  ;;  %v42_v1 = vld [vmem:[%s963_s1 + $0x8] sm:$0xff]  ;;  %v43_v2 = vld [vmem:[%s963_s1 + $0x10] sm:$0xff]  ;;  %642 = vmatprep.subr.bf16.mxu0 %v712_v3  ;;  %562 = vmatprep.mubr.msk.f32.mxu0 %vm713_vm0, %v714_v6  ;;  %vm318_vm2 = vcmask 130048   ;;  %vm413_vm3 = vcmask 31744  }
   0x2   :  { %v643_v4 = vpack.c.bf16 %v42_v1, %v41_v0  ;;  %v44_v5 = vld [vmem:[%s963_s1 + $0x18] sm:$0xff]  ;;  %654 = vmatprep.subr.bf16.mxu1 %v712_v3  ;;  %597 = vmatprep.mubr.msk.f32.mxu1 %vm713_vm0, %v714_v6  ;;  %v50_v8 = vld [vmem:[%s965_s3] sm:$0xff]  ;;  %v51_v9 = vld [vmem:[%s965_s3 + $0x8] sm:$0xff] }
   0x3   :  { %v646_v7 = vpack.c.bf16 %v44_v5, %v43_v2  ;;  %v52_v10 = vld [vmem:[%s965_s3 + $0x10] sm:$0xff]  ;;  %v45_v11 = vld [vmem:[%s963_s1 + $0x20] sm:$0xff]  ;;  %v46_v12 = vld [vmem:[%s963_s1 + $0x28] sm:$0xff]  ;;  %v655_v13 = vpack.c.bf16 %v51_v9, %v50_v8 }
   0x4   :  { %644 = vmatpush3.bf16.msra.mxu0 %v643_v4  ;;  %v53_v14 = vld [vmem:[%s965_s3 + $0x18] sm:$0xff]  ;;  %v649_v16 = vpack.c.bf16 %v46_v12, %v45_v11  ;;  %v54_v17 = vld [vmem:[%s965_s3 + $0x20] sm:$0xff]  ;;  %v55_v18 = vld [vmem:[%s965_s3 + $0x28] sm:$0xff] }
   0x5   :  { %645 = vmatprep.subr.bf16.mxu0 %v712_v3  ;;  %656 = vmatpush3.bf16.msra.mxu1 %v655_v13  ;;  %v658_v15 = vpack.c.bf16 %v53_v14, %v52_v10  ;;  %v47_v19 = vld [vmem:[%s963_s1 + $0x30] sm:$0xff]  ;;  %v48_v20 = vld [vmem:[%s963_s1 + $0x38] sm:$0xff]  ;;  %v661_v21 = vpack.c.bf16 %v55_v18, %v54_v17  ;;  %v40_v26 = vld [vmem:[%s962_s0] sm:$0xff] }
   0x6   :  { %657 = vmatprep.subr.bf16.mxu1 %v712_v3  ;;  %v652_v22 = vpack.c.bf16 %v48_v20, %v47_v19  ;;  %v56_v23 = vld [vmem:[%s965_s3 + $0x30] sm:$0xff]  ;;  %v57_v24 = vld [vmem:[%s965_s3 + $0x38] sm:$0xff]  ;;  %v58_v27 = vld [vmem:[%s965_s3 + $0x40] sm:$0xff] }
   0x7   :  { %v664_v25 = vpack.c.bf16 %v57_v24, %v56_v23  ;;  %v59_v28 = vld [vmem:[%s965_s3 + $0x48] sm:$0xff]  ;;  %v60_v30 = vld [vmem:[%s965_s3 + $0x50] sm:$0xff]  ;;  %v61_v31 = vld [vmem:[%s965_s3 + $0x58] sm:$0xff] }
   0x8   :  { %647 = vmatpush3.bf16.msra.mxu0 %v646_v7  ;;  %v667_v29 = vpack.c.bf16 %v59_v28, %v58_v27  ;;  %v670_v32 = vpack.c.bf16 %v61_v31, %v60_v30  ;;  %v62_v33 = vld [vmem:[%s965_s3 + $0x60] sm:$0xff]  ;;  %v63_v34 = vld [vmem:[%s965_s3 + $0x68] sm:$0xff]  ;;  %v64_v36 = vld [vmem:[%s965_s3 + $0x70] sm:$0xff] }
   0x9   :  { %648 = vmatprep.subr.bf16.mxu0 %v712_v3  ;;  %659 = vmatpush3.bf16.msra.mxu1 %v658_v15  ;;  %v673_v35 = vpack.c.bf16 %v63_v34, %v62_v33  ;;  %v65_v37 = vld [vmem:[%s965_s3 + $0x78] sm:$0xff]  ;;  %v67_v39 = vld [vmem:[%s967_s5] sm:$0xff]  ;;  %v68_v40 = vld [vmem:[%s967_s5 + $0x8] sm:$0xff] }
   0xa   :  { %660 = vmatprep.subr.bf16.mxu1 %v712_v3  ;;  %v676_v38 = vpack.c.bf16 %v65_v37, %v64_v36  ;;  %v69_v41 = vld [vmem:[%s967_s5 + $0x10] sm:$0xff]  ;;  %v679_v42 = vpack.c.bf16 %v68_v40, %v67_v39  ;;  %v70_v43 = vld [vmem:[%s967_s5 + $0x18] sm:$0xff]  ;;  %v71_v45 = vld [vmem:[%s967_s5 + $0x20] sm:$0xff] }
   0xb   :  { %v682_v44 = vpack.c.bf16 %v70_v43, %v69_v41  ;;  %v72_v46 = vld [vmem:[%s967_s5 + $0x28] sm:$0xff]  ;;  %v73_v48 = vld [vmem:[%s967_s5 + $0x30] sm:$0xff]  ;;  %v74_v49 = vld [vmem:[%s967_s5 + $0x38] sm:$0xff] }
   0xc   :  { %650 = vmatpush3.bf16.msra.mxu0 %v649_v16  ;;  %v685_v47 = vpack.c.bf16 %v72_v46, %v71_v45  ;;  %v688_v50 = vpack.c.bf16 %v74_v49, %v73_v48  ;;  %v75_v51 = vld [vmem:[%s967_s5 + $0x40] sm:$0xff]  ;;  %v76_v52 = vld [vmem:[%s967_s5 + $0x48] sm:$0xff]  ;;  %v77_v59 = vld [vmem:[%s967_s5 + $0x50] sm:$0xff] }
   0xd   :  { %651 = vmatprep.subr.bf16.mxu0 %v712_v3  ;;  %662 = vmatpush3.bf16.msra.mxu1 %v661_v21  ;;  %v691_v53 = vpack.c.bf16 %v76_v52, %v75_v51  ;;  %v493_v54 = vld [vmem:[%s964_s2] ss:$0 sm:$0xff]  ;;  %v78_v60 = vld [vmem:[%s967_s5 + $0x58] sm:$0xff]  ;;  %v80_v63 = vld [vmem:[%s967_s5 + $0x68] sm:$0xff] }
   0xe   :  { %663 = vmatprep.subr.bf16.mxu1 %v712_v3  ;;  %v694_v61 = vpack.c.bf16 %v78_v60, %v77_v59  ;;  %v79_v62 = vld [vmem:[%s967_s5 + $0x60] sm:$0xff]  ;;  %v81_v1 = vld [vmem:[%s967_s5 + $0x70] sm:$0xff]  ;;  %v82_v2 = vld [vmem:[%s967_s5 + $0x78] sm:$0xff] }
   0xf   :  { %v697_v0 = vpack.c.bf16 %v80_v63, %v79_v62  ;;  %v700_v4 = vpack.c.bf16 %v82_v2, %v81_v1  ;;  %v495_v5 = vld [vmem:[%s966_s4] ss:$0 sm:$0xff]  ;;  %v332_v11 = vld [vmem:[%s970_s8 + $0x8] sm:$0xff] }
  0x10   :  { %653 = vmatpush3.bf16.msra.mxu0 %v652_v22  ;;  %v331_v10 = vld [vmem:[%s970_s8] sm:$0xff] }
  0x11   :  { %678 = vmatprep.subr.bf16.mxu0 %v712_v3  ;;  %665 = vmatpush3.bf16.msra.mxu1 %v664_v25  ;;  %v496_v12 = vld [vmem:[%s968_s6] ss:$0 sm:$0xff] }
  0x12   :  { %666 = vmatprep.subr.bf16.mxu1 %v712_v3  ;;  %v320_v14 = vld [vmem:[%s972_s10] sm:$0xff] }
  0x13   :  { %563 = vmatmul.mubr.msk.f32.vlgmr.msra.gmra.mrb[0].mxu0 %vm90_vm1, %v40_v26  ;;  %v497_v17 = vld [vmem:[%s969_s7] ss:$0 sm:$0xff] }
  0x14   :  { %632 = vmatprep.mubr.msk.f32.mxu0 %vm713_vm0, %v714_v6  ;;  %680 = vmatpush3.bf16.msra.mxu0 %v679_v42  ;;  %v498_v22 = vld [vmem:[%s971_s9] ss:$0 sm:$0xff] }
  0x15   :  { %668 = vmatpush3.bf16.msra.mxu1 %v667_v29  ;;  %681 = vmatprep.subr.bf16.mxu0 %v712_v3 }
  0x16   :  { %669 = vmatprep.subr.bf16.mxu1 %v712_v3 }
  0x18   :  { %683 = vmatpush3.bf16.msra.mxu0 %v682_v44 }
  0x19   :  { %671 = vmatpush3.bf16.msra.mxu1 %v670_v32  ;;  %684 = vmatprep.subr.bf16.mxu0 %v712_v3 }
  0x1a   :  { %672 = vmatprep.subr.bf16.mxu1 %v712_v3 }
  0x1c   :  { %686 = vmatpush3.bf16.msra.mxu0 %v685_v47 }
  0x1d   :  { %674 = vmatpush3.bf16.msra.mxu1 %v673_v35  ;;  %687 = vmatprep.subr.bf16.mxu0 %v712_v3 }
  0x1e   :  { %675 = vmatprep.subr.bf16.mxu1 %v712_v3 }
  0x20   :  { %689 = vmatpush3.bf16.msra.mxu0 %v688_v50 }
  0x21   :  { %677 = vmatpush3.bf16.msra.mxu1 %v676_v38  ;;  %690 = vmatprep.subr.bf16.mxu0 %v712_v3 }
  0x22   :  { %702 = vmatprep.subr.bf16.mxu1 %v712_v3 }
  0x24   :  { %692 = vmatpush3.bf16.msra.mxu0 %v691_v53 }
  0x25   :  { %693 = vmatprep.subr.bf16.mxu0 %v712_v3 }
  0x28   :  { %695 = vmatpush3.bf16.msra.mxu0 %v694_v61 }
  0x29   :  { %696 = vmatprep.subr.bf16.mxu0 %v712_v3 }
  0x2c   :  { %698 = vmatpush3.bf16.msra.mxu0 %v697_v0 }
  0x2d   :  { %699 = vmatprep.subr.bf16.mxu0 %v712_v3  ;;  %v703_v3 = vpack.c.bf16 %v332_v11, %v331_v10 }
  0x30   :  { %701 = vmatpush3.bf16.msra.mxu0 %v700_v4 }
  0xe6   :  { %v160_v55 = vpop.f32.mrb[0].mxu0 }
  0xe7   :  { %v161_v56 = vadd.f32 %v493_v54, %v160_v55  ;;  %v564_v57 = vpop.f32.mrb[1].mxu0 }
  0xe9   :  { %708 = vtanh.f32 %v161_v56 }
  0xf3   :  { %v709_v58 = vpop.eup %708 }
  0xf4   :  { %598 = vmatmul.mubr.f32.vlgmr.msra.gmra.mrb[0].mxu1 %v709_v58 }
  0xf5   :  { %639 = vmatprep.mubr.msk.f32.mxu1 %vm713_vm0, %v714_v6  ;;  %704 = vmatpush3.bf16.msra.mxu1 %v703_v3 }
 0x1c7   :  { %v237_v6 = vpop.f32.mrb[0].mxu1 }
 0x1c8   :  { %v238_v7 = vadd.f32 %v495_v5, %v237_v6  ;;  %v599_v8 = vpop.f32.mrb[1].mxu1 }
 0x1ca   :  { %710 = vtanh.f32 %v238_v7 }
 0x1d4   :  { %v711_v9 = vpop.eup %710 }
 0x1d5   :  { %633 = vmatmul.mubr.f32.vlgmr.msra.gmra.mrb[2].mxu0 %v711_v9 }
 0x2a8   :  { %v314_v13 = vpop.f32.mrb[2].mxu0 }
 0x2a9   :  { %v315_v15 = vadd.f32 %v496_v12, %v314_v13  ;;  %v634_v16 = vpop.f32.mrb[3].mxu0 }
 0x2ab   :  { %319 = vst.msk [vmem:[#allocation2] sm:$0xff] %vm318_vm2, %v315_v15  ;;  %v321_v18 = vsub.f32 %v320_v14, %v315_v15 }
 0x2ad   :  { %v329_v19 = vmul.f32 %v497_v17, %v321_v18 }
 0x2af   :  { %v330_v20 = vmul.f32 %v329_v19, %v329_v19 }
 0x2b1   :  { %640 = vmatmul.mubr.msk.f32.vlgmr.msra.gmra.mrb[2].mxu1 %vm318_vm2, %v330_v20 }
 0x2b2   :  { %v432_v21 = vld [vmem:[#allocation2] sm:$0x3] }
 0x2b3   :  { %433 = vst [vmem:[%s973_s11] sm:$0x3] %v432_v21 }
 0x384   :  { %v409_v23 = vpop.f32.mrb[2].mxu1 }
 0x385   :  { %v410_v24 = vadd.f32 %v498_v22, %v409_v23  ;;  %v641_v25 = vpop.f32.mrb[3].mxu1 }
 0x387   :  { %414 = vst.msk [vmem:[#allocation3] sm:$0xff] %vm413_vm3, %v410_v24 }
 0x38e   :  { %v465_v26 = vld [vmem:[#allocation3] sm:$0x3] }
 0x38f   :  { %466 = vst [vmem:[%s974_s12] sm:$0x3] %v465_v26 }

</bundles_post_ra>
